<compile_context>
chip_gen: v5e
topology: v5e:2x2
jax: 0.10.0
libtpu: 0.0.40
codegen_flags: <defaults>
</compile_context>

<pallas_src>
import numpy as np
import jax
import jax.numpy as jnp
from jax.experimental import pallas as pl
from jax.experimental.pallas import tpu as pltpu


def critic_kernel(x_ref, win_ref, bin_ref, w1_ref, b1_ref,
                  w2_ref, b2_ref, w3_ref, b3_ref, out_ref):
    f32 = jnp.float32

    # merged state/action branches: tanh(x @ blockdiag(ws, wa) + [bs, ba])
    h = jnp.tanh(jnp.dot(x_ref[...], win_ref[...], preferred_element_type=f32)
                 + bin_ref[...])                                   # (TB, 256)

    # Linear(256,256) + LeakyReLU(0.2)   (Dropout = identity in eval mode)
    h = jnp.dot(h, w1_ref[...], preferred_element_type=f32) + b1_ref[...]
    h = jnp.where(h >= 0, h, 0.2 * h)                              # (TB, 256)

    # Linear(256,64) + Tanh   (BatchNorm1d(256) eval-fold is in w2/b2)
    h = jnp.tanh(jnp.dot(h, w2_ref[...], preferred_element_type=f32)
                 + b2_ref[...])                                    # (TB, 64)

    # Linear(64,1) padded to 128 lanes   (BN(64) eval-fold is in w3/b3)
    out_ref[...] = (jnp.dot(h, w3_ref[...], preferred_element_type=f32)
                    + b3_ref[...])                                 # (TB, 128)


def critic_forward(states, actions, params, tile_b=128):
    B = states.shape[0]
    x = jnp.concatenate([states, actions], axis=1).astype(jnp.float32)
    n_in = x.shape[1]

    # pad batch up to a multiple of the tile (padded rows are discarded)
    n_blk = pl.cdiv(B, tile_b)
    Bp = n_blk * tile_b
    if Bp != B:
        x = jnp.pad(x, ((0, Bp - B), (0, 0)))

    def resident(shape):
        # weights/biases: same block every grid step -> DMA'd once, VMEM-resident
        return pl.BlockSpec(shape, lambda i: (0, 0))

    p = params
    out = pl.pallas_call(
        critic_kernel,
        out_shape=jax.ShapeDtypeStruct((Bp, 128), jnp.float32),
        grid=(n_blk,),
        in_specs=[
            pl.BlockSpec((tile_b, n_in), lambda i: (i, 0)),   # x (batch-tiled)
            resident(p["w_in"].shape), resident(p["b_in"].shape),
            resident(p["w1"].shape),   resident(p["b1"].shape),
            resident(p["w2"].shape),   resident(p["b2"].shape),
            resident(p["w3"].shape),   resident(p["b3"].shape),
        ],
        out_specs=pl.BlockSpec((tile_b, 128), lambda i: (i, 0)),
        compiler_params=pltpu.CompilerParams(
            dimension_semantics=("parallel",)),
    )(x, p["w_in"], p["b_in"], p["w1"], p["b1"],
      p["w2"], p["b2"], p["w3"], p["b3"])

    return out[:B, :1]


def make_params(key, n_states, n_actions):
    ks = jax.random.split(key, 10)
    eps = 1e-5

    def lin(kw, kb, n_in, n_out):
        # PyTorch: weight.normal_(0, 0.01) shape (out,in); bias.uniform_(-0.1, 0.1)
        w = 0.01 * jax.random.normal(kw, (n_out, n_in), jnp.float32)
        b = jax.random.uniform(kb, (1, n_out), jnp.float32, -0.1, 0.1)
        return w.T, b  # (in, out) for lane-dense x @ W

    ws, bs = lin(ks[0], ks[1], n_states, 128)
    wa, ba = lin(ks[2], ks[3], n_actions, 128)
    w1, b1 = lin(ks[4], ks[5], 256, 256)
    w2, b2 = lin(ks[6], ks[7], 256, 64)
    w3, b3 = lin(ks[8], ks[9], 64, 1)

    # BatchNorm1d eval-mode with default stats/affine:
    # gamma=1, beta=0, running_mean=0, running_var=1
    def bn_fold(n):
        gamma = jnp.ones((1, n), jnp.float32)
        beta = jnp.zeros((1, n), jnp.float32)
        mean = jnp.zeros((1, n), jnp.float32)
        var = jnp.ones((1, n), jnp.float32)
        scale = gamma / jnp.sqrt(var + eps)
        shift = beta - mean * scale
        return scale, shift

    sc1, sh1 = bn_fold(256)
    sc2, sh2 = bn_fold(64)

    # --- wrapper-side fusions -------------------------------------------
    # block-diagonal merge of the two input branches
    w_in = jnp.zeros((n_states + n_actions, 256), jnp.float32)
    w_in = w_in.at[:n_states, :128].set(ws)
    w_in = w_in.at[n_states:, 128:].set(wa)
    b_in = jnp.concatenate([bs, ba], axis=1)                  # (1, 256)

    # fold BN1 into Linear(256,64):  (h*sc1+sh1)@w2+b2 == h@(sc1.T*w2)+(sh1@w2+b2)
    w2f = sc1.T * w2
    b2f = sh1 @ w2 + b2

    # fold BN2 into Linear(64,1)
    w3f = sc2.T * w3
    b3f = sh2 @ w3 + b3

    # pad final projection to 128 output lanes -> lane-dense output store
    w3p = jnp.zeros((64, 128), jnp.float32).at[:, :1].set(w3f)
    b3p = jnp.zeros((1, 128), jnp.float32).at[:, :1].set(b3f)

    fused = dict(w_in=w_in, b_in=b_in, w1=w1, b1=b1,
                 w2=w2f, b2=b2f, w3=w3p, b3=b3p)
    raw = dict(ws=ws, bs=bs, wa=wa, ba=ba, w1=w1, b1=b1, w2=w2, b2=b2,
               w3=w3, b3=b3, sc1=sc1, sh1=sh1, sc2=sc2, sh2=sh2)
    return fused, raw


def critic_ref(states, actions, p):
    # unfused reference (mirrors the PyTorch module in eval mode)
    s = jnp.tanh(states @ p["ws"] + p["bs"])
    a = jnp.tanh(actions @ p["wa"] + p["ba"])
    x = jnp.concatenate([s, a], axis=1)
    h = x @ p["w1"] + p["b1"]
    h = jnp.where(h >= 0, h, 0.2 * h)
    h = h * p["sc1"] + p["sh1"]            # Dropout=identity, BN(256) eval
    h = jnp.tanh(h @ p["w2"] + p["b2"])
    h = h * p["sc2"] + p["sh2"]            # Dropout=identity, BN(64) eval
    return h @ p["w3"] + p["b3"]


if __name__ == "__main__":
    B, n_states, n_actions = 8, 16, 8
    key = jax.random.PRNGKey(0)
    k_s, k_a, k_p = jax.random.split(key, 3)

    states = jax.random.normal(k_s, (B, n_states), jnp.float32)
    actions = jax.random.normal(k_a, (B, n_actions), jnp.float32)
    fused_params, raw_params = make_params(k_p, n_states, n_actions)

    out = critic_forward(states, actions, fused_params)
    out = jax.block_until_ready(out)

    ref = critic_ref(states, actions, raw_params)
    np.testing.assert_allclose(np.asarray(out), np.asarray(ref),
                               rtol=1e-5, atol=1e-5)
    assert out.shape == (B, 1)
    print("KERNEL_OK")
</pallas_src>

<mosaic_0001>
module attributes {stable_mosaic.version = 11 : i64} {
  func.func @critic_kernel(%arg0: i32, %arg1: memref<128x24xf32, #tpu.memory_space<vmem>>, %arg2: memref<24x256xf32, #tpu.memory_space<vmem>>, %arg3: memref<1x256xf32, #tpu.memory_space<vmem>>, %arg4: memref<256x256xf32, #tpu.memory_space<vmem>>, %arg5: memref<1x256xf32, #tpu.memory_space<vmem>>, %arg6: memref<256x64xf32, #tpu.memory_space<vmem>>, %arg7: memref<1x64xf32, #tpu.memory_space<vmem>>, %arg8: memref<64x128xf32, #tpu.memory_space<vmem>>, %arg9: memref<1x128xf32, #tpu.memory_space<vmem>>, %arg10: memref<128x128xf32, #tpu.memory_space<vmem>>) attributes {dimension_semantics = [#tpu.dimension_semantics<parallel>], iteration_bounds = array<i64: 1>, scalar_prefetch = 0 : i64, scratch_operands = 0 : i64, tpu.core_type = #tpu.core_type<tc>, window_params = [{transform_indices = @transform_0, window_bounds = array<i64: 128, 24>}, {pipeline_mode = #tpu.pipeline_mode<synchronous>, transform_indices = @transform_1, window_bounds = array<i64: 24, 256>}, {pipeline_mode = #tpu.pipeline_mode<synchronous>, transform_indices = @transform_2, window_bounds = array<i64: 1, 256>}, {pipeline_mode = #tpu.pipeline_mode<synchronous>, transform_indices = @transform_3, window_bounds = array<i64: 256, 256>}, {pipeline_mode = #tpu.pipeline_mode<synchronous>, transform_indices = @transform_4, window_bounds = array<i64: 1, 256>}, {pipeline_mode = #tpu.pipeline_mode<synchronous>, transform_indices = @transform_5, window_bounds = array<i64: 256, 64>}, {pipeline_mode = #tpu.pipeline_mode<synchronous>, transform_indices = @transform_6, window_bounds = array<i64: 1, 64>}, {pipeline_mode = #tpu.pipeline_mode<synchronous>, transform_indices = @transform_7, window_bounds = array<i64: 64, 128>}, {pipeline_mode = #tpu.pipeline_mode<synchronous>, transform_indices = @transform_8, window_bounds = array<i64: 1, 128>}, {transform_indices = @transform_9, window_bounds = array<i64: 128, 128>}]} {
    %c0 = arith.constant 0 : index
    %c0_0 = arith.constant 0 : index
    %0 = vector.load %arg1[%c0, %c0_0] : memref<128x24xf32, #tpu.memory_space<vmem>>, vector<128x24xf32>
    %c0_1 = arith.constant 0 : index
    %c0_2 = arith.constant 0 : index
    %1 = vector.load %arg2[%c0_1, %c0_2] : memref<24x256xf32, #tpu.memory_space<vmem>>, vector<24x256xf32>
    %cst = arith.constant dense<0.000000e+00> : vector<128x256xf32>
    %2 = tpu.matmul %0, %1, %cst {dimension_numbers = #tpu.dot_dimension_numbers<[1], [0], [0], [1], [0, 0, 1, 1], [], []>} : vector<128x24xf32>, vector<24x256xf32>, vector<128x256xf32> -> vector<128x256xf32>
    %c0_3 = arith.constant 0 : index
    %c0_4 = arith.constant 0 : index
    %3 = vector.load %arg3[%c0_3, %c0_4] : memref<1x256xf32, #tpu.memory_space<vmem>>, vector<1x256xf32>
    %4 = vector.broadcast %3 : vector<1x256xf32> to vector<128x256xf32>
    %5 = arith.addf %2, %4 : vector<128x256xf32>
    %6 = math.tanh %5 : vector<128x256xf32>
    %c0_5 = arith.constant 0 : index
    %c0_6 = arith.constant 0 : index
    %7 = vector.load %arg4[%c0_5, %c0_6] : memref<256x256xf32, #tpu.memory_space<vmem>>, vector<256x256xf32>
    %cst_7 = arith.constant dense<0.000000e+00> : vector<128x256xf32>
    %8 = tpu.matmul %6, %7, %cst_7 {dimension_numbers = #tpu.dot_dimension_numbers<[1], [0], [0], [1], [0, 0, 1, 1], [], []>} : vector<128x256xf32>, vector<256x256xf32>, vector<128x256xf32> -> vector<128x256xf32>
    %c0_8 = arith.constant 0 : index
    %c0_9 = arith.constant 0 : index
    %9 = vector.load %arg5[%c0_8, %c0_9] : memref<1x256xf32, #tpu.memory_space<vmem>>, vector<1x256xf32>
    %10 = vector.broadcast %9 : vector<1x256xf32> to vector<128x256xf32>
    %11 = arith.addf %8, %10 : vector<128x256xf32>
    %cst_10 = arith.constant 0.000000e+00 : f32
    %12 = vector.broadcast %cst_10 : f32 to vector<128x256xf32>
    %13 = arith.cmpf oge, %11, %12 : vector<128x256xf32>
    %cst_11 = arith.constant 2.000000e-01 : f32
    %14 = vector.broadcast %cst_11 : f32 to vector<128x256xf32>
    %15 = arith.mulf %14, %11 : vector<128x256xf32>
    %16 = arith.select %13, %11, %15 : vector<128x256xi1>, vector<128x256xf32>
    %c0_12 = arith.constant 0 : index
    %c0_13 = arith.constant 0 : index
    %17 = vector.load %arg6[%c0_12, %c0_13] : memref<256x64xf32, #tpu.memory_space<vmem>>, vector<256x64xf32>
    %cst_14 = arith.constant dense<0.000000e+00> : vector<128x64xf32>
    %18 = tpu.matmul %16, %17, %cst_14 {dimension_numbers = #tpu.dot_dimension_numbers<[1], [0], [0], [1], [0, 0, 1, 1], [], []>} : vector<128x256xf32>, vector<256x64xf32>, vector<128x64xf32> -> vector<128x64xf32>
    %c0_15 = arith.constant 0 : index
    %c0_16 = arith.constant 0 : index
    %19 = vector.load %arg7[%c0_15, %c0_16] : memref<1x64xf32, #tpu.memory_space<vmem>>, vector<1x64xf32>
    %20 = vector.broadcast %19 : vector<1x64xf32> to vector<128x64xf32>
    %21 = arith.addf %18, %20 : vector<128x64xf32>
    %22 = math.tanh %21 : vector<128x64xf32>
    %c0_17 = arith.constant 0 : index
    %c0_18 = arith.constant 0 : index
    %23 = vector.load %arg8[%c0_17, %c0_18] : memref<64x128xf32, #tpu.memory_space<vmem>>, vector<64x128xf32>
    %cst_19 = arith.constant dense<0.000000e+00> : vector<128x128xf32>
    %24 = tpu.matmul %22, %23, %cst_19 {dimension_numbers = #tpu.dot_dimension_numbers<[1], [0], [0], [1], [0, 0, 1, 1], [], []>} : vector<128x64xf32>, vector<64x128xf32>, vector<128x128xf32> -> vector<128x128xf32>
    %c0_20 = arith.constant 0 : index
    %c0_21 = arith.constant 0 : index
    %25 = vector.load %arg9[%c0_20, %c0_21] : memref<1x128xf32, #tpu.memory_space<vmem>>, vector<1x128xf32>
    %26 = vector.broadcast %25 : vector<1x128xf32> to vector<128x128xf32>
    %27 = arith.addf %24, %26 : vector<128x128xf32>
    %c0_22 = arith.constant 0 : index
    %c0_23 = arith.constant 0 : index
    %28 = vector.load %arg10[%c0_22, %c0_23] : memref<128x128xf32, #tpu.memory_space<vmem>>, vector<128x128xf32>
    tpu.vector_store %arg10[%c0_22, %c0_23], %27 {strides = array<i32>} : memref<128x128xf32, #tpu.memory_space<vmem>>, vector<128x128xf32>,
    return
  }
  func.func @transform_0(%arg0: i32) -> (i32, i32) {
    %c0_i32 = arith.constant 0 : i32
    %c0_i32_0 = arith.constant 0 : i32
    return %arg0, %c0_i32 : i32, i32
  }
  func.func @transform_1(%arg0: i32) -> (i32, i32) {
    %c0_i32 = arith.constant 0 : i32
    %c0_i32_0 = arith.constant 0 : i32
    %c0_i32_1 = arith.constant 0 : i32
    return %c0_i32, %c0_i32_0 : i32, i32
  }
  func.func @transform_2(%arg0: i32) -> (i32, i32) {
    %c0_i32 = arith.constant 0 : i32
    %c0_i32_0 = arith.constant 0 : i32
    %c0_i32_1 = arith.constant 0 : i32
    return %c0_i32, %c0_i32_0 : i32, i32
  }
  func.func @transform_3(%arg0: i32) -> (i32, i32) {
    %c0_i32 = arith.constant 0 : i32
    %c0_i32_0 = arith.constant 0 : i32
    %c0_i32_1 = arith.constant 0 : i32
    return %c0_i32, %c0_i32_0 : i32, i32
  }
  func.func @transform_4(%arg0: i32) -> (i32, i32) {
    %c0_i32 = arith.constant 0 : i32
    %c0_i32_0 = arith.constant 0 : i32
    %c0_i32_1 = arith.constant 0 : i32
    return %c0_i32, %c0_i32_0 : i32, i32
  }
  func.func @transform_5(%arg0: i32) -> (i32, i32) {
    %c0_i32 = arith.constant 0 : i32
    %c0_i32_0 = arith.constant 0 : i32
    %c0_i32_1 = arith.constant 0 : i32
    return %c0_i32, %c0_i32_0 : i32, i32
  }
  func.func @transform_6(%arg0: i32) -> (i32, i32) {
    %c0_i32 = arith.constant 0 : i32
    %c0_i32_0 = arith.constant 0 : i32
    %c0_i32_1 = arith.constant 0 : i32
    return %c0_i32, %c0_i32_0 : i32, i32
  }
  func.func @transform_7(%arg0: i32) -> (i32, i32) {
    %c0_i32 = arith.constant 0 : i32
    %c0_i32_0 = arith.constant 0 : i32
    %c0_i32_1 = arith.constant 0 : i32
    return %c0_i32, %c0_i32_0 : i32, i32
  }
  func.func @transform_8(%arg0: i32) -> (i32, i32) {
    %c0_i32 = arith.constant 0 : i32
    %c0_i32_0 = arith.constant 0 : i32
    %c0_i32_1 = arith.constant 0 : i32
    return %c0_i32, %c0_i32_0 : i32, i32
  }
  func.func @transform_9(%arg0: i32) -> (i32, i32) {
    %c0_i32 = arith.constant 0 : i32
    %c0_i32_0 = arith.constant 0 : i32
    return %arg0, %c0_i32 : i32, i32
  }
}

</mosaic_0001>

<bundles_post_ra>
// kernel: tpu_custom_call.1
= control target key start
LH: loop header
LB: loop body
LE: loop exit
PB: predicated region body
PF: predicated region fallthrough
CT: control target
= control target key end

     0   :  { %14 = vsyncpa [#allocation3], 0  ;;  %s1712_s0 = inlined_call_operand.vmem [shape: f32[128,24], index: 0, kind: input, shape index: {}]   ;;  %s1713_s1 = inlined_call_operand.vmem [shape: f32[24,256], index: 1, kind: input, shape index: {}]   ;;  %s1714_s2 = inlined_call_operand.vmem [shape: f32[1,256], index: 2, kind: input, shape index: {}]   ;;  %s1715_s3 = inlined_call_operand.hbm [shape: f32[256,256], index: 3, kind: input, shape index: {}]   ;;  %s1716_s4 = inlined_call_operand.vmem [shape: f32[1,256], index: 4, kind: input, shape index: {}]   ;;  %s1717_s5 = inlined_call_operand.vmem [shape: f32[256,64], index: 5, kind: input, shape index: {}]   ;;  %s1718_s6 = inlined_call_operand.vmem [shape: f32[1,64], index: 6, kind: input, shape index: {}]   ;;  %s1719_s7 = inlined_call_operand.vmem [shape: f32[64,128], index: 7, kind: input, shape index: {}]   ;;  %s1720_s8 = inlined_call_operand.vmem [shape: f32[1,128], index: 8, kind: input, shape index: {}]   ;;  %s1721_s9 = inlined_call_operand.hbm [shape: f32[128,128], index: 9, kind: output, shape index: {}]  }
   0x1   :  { %15 = vsyncpa [#allocation4], 0  ;;  %s26_s11 = sshll.u32 %s1715_s3, 4  ;;  %s1270_s12 = smov [#allocation2]   ;;  %s27_s11 = int_to_ptr.hbm [resolvable:$true] %s26_s11 }
   0x2   :  { %s28_s13 = sshll.u32 %s1270_s12, 4  ;;  %s1271_s14 = smov 256   ;;  %s29_s13 = int_to_ptr.vmem [resolvable:$true] %s28_s13 }
   0x3   :  { %s1272_s15 = smov 16  }
   0x4   :  { %34 = dma.hbm_to_vmem [thread:$0]  %s27_s11, 8192, %s29_s13, [#allocation3], %s1271_s14, %s1271_s14, %s1272_s15  }
   0x5   :  { %1266 = dma.done.wait [#allocation3], 8192  }
   0x6   :  { %1267 = vsyncadd [#allocation3], 4294959104  ;;  %v69_v0 = vld [vmem:[%s1713_s1 + $0x20] sm:$0xff]  ;;  %v67_v1 = vld [vmem:[%s1713_s1 + $0x10] sm:$0xff]  ;;  %vm77_vm0 = vcmask 195584   ;;  %s1044_s23 = sshll.u32 %s1721_s9, 4  ;;  %s1045_s23 = int_to_ptr.hbm [resolvable:$true] %s1044_s23 }
   0x7   :  { %139 = vmatpush.msra.mxu0 %v69_v0  ;;  %1105 = vmatpush.msra.mxu1 %v69_v0  ;;  %v65_v2 = vld [vmem:[%s1713_s1] sm:$0xff]  ;;  %v70_v5 = vld [vmem:[%s1713_s1 + $0x28] sm:$0xff]  ;;  %v68_v6 = vld [vmem:[%s1713_s1 + $0x18] sm:$0xff]  ;;  %s1274_s24 = smov 128   ;;  %s1275_s25 = smov 8  }
   0x8   :  { %1106 = vmatpush.msra.mxu2 %v69_v0  ;;  %1107 = vmatpush.msra.mxu3 %v69_v0  ;;  %v49_v3 = vld [vmem:[%s1712_s0] sm:$0xff]  ;;  %v66_v7 = vld [vmem:[%s1713_s1 + $0x8] sm:$0xff]  ;;  %v51_v10 = vld [vmem:[%s1712_s0 + $0x10] sm:$0xff] }
   0x9   :  { %140 = vmatpush.msra.mxu0 %v67_v1  ;;  %1108 = vmatpush.msra.mxu1 %v67_v1  ;;  %v53_v4 = vld [vmem:[%s1712_s0 + $0x20] sm:$0xff]  ;;  %v50_v8 = vld [vmem:[%s1712_s0 + $0x8] sm:$0xff]  ;;  %v1369_v11 = vld [vmem:[%s1712_s0 + $0x30] sm:$0xff] }
   0xa   :  { %1109 = vmatpush.msra.mxu2 %v67_v1  ;;  %1110 = vmatpush.msra.mxu3 %v67_v1  ;;  %v54_v9 = vld [vmem:[%s1712_s0 + $0x28] sm:$0xff]  ;;  %v351_v12 = vld [vmem:[#allocation2 + $0x1f8] sm:$0xff]  ;;  %v1388_v16 = vld [vmem:[%s1712_s0 + $0x40] sm:$0xff] }
   0xb   :  { %141 = vmatpush.msra.mxu0 %v65_v2  ;;  %1111 = vmatpush.msra.mxu1 %v65_v2  ;;  %v52_v13 = vld [vmem:[%s1712_s0 + $0x18] sm:$0xff]  ;;  %v349_v15 = vld [vmem:[#allocation2 + $0x1e8] sm:$0xff]  ;;  %v1406_v22 = vld [vmem:[%s1712_s0 + $0x50] sm:$0xff] }
   0xc   :  { %1057 = vmatmul.msk.f32.vlgmr.msra.gmra.mxu0 %vm77_vm0, %v49_v3  ;;  %1061 = vmatmul.msk.f32.vlgmr.msra.gmra.mxu1 %vm77_vm0, %v53_v4  ;;  %v1380_v14 = vld [vmem:[%s1712_s0 + $0x38] sm:$0xff]  ;;  %v345_v18 = vld [vmem:[#allocation2 + $0x1c8] sm:$0xff]  ;;  %v318_v24 = vld [vmem:[#allocation2 + $0xf0] sm:$0xff] }
   0xd   :  { %204 = vmatpush.msrb.mxu1 %v70_v5  ;;  %1112 = vmatpush.msra.mxu2 %v65_v2  ;;  %v347_v17 = vld [vmem:[#allocation2 + $0x1d8] sm:$0xff]  ;;  %v1398_v20 = vld [vmem:[%s1712_s0 + $0x48] sm:$0xff]  ;;  %v316_v26 = vld [vmem:[#allocation2 + $0xe0] sm:$0xff] }
   0xe   :  { %1113 = vmatpush.msra.mxu3 %v65_v2  ;;  %v343_v19 = vld [vmem:[#allocation2 + $0x1b8] sm:$0xff]  ;;  %v341_v21 = vld [vmem:[#allocation2 + $0x1a8] sm:$0xff]  ;;  %1066 = vmatmul.msk.f32.vlgmr.msra.gmra.mxu2 %vm77_vm0, %v1398_v20  ;;  %v314_v28 = vld [vmem:[#allocation2 + $0xd0] sm:$0xff] }
   0xf   :  { %205 = vmatpush.msrb.mxu1 %v68_v6  ;;  %v339_v23 = vld [vmem:[#allocation2 + $0x198] sm:$0xff]  ;;  %358 = vmatpush.msrb.mxu2 %v318_v24  ;;  %v317_v27 = vld [vmem:[#allocation2 + $0xe8] sm:$0xff]  ;;  %v312_v32 = vld [vmem:[#allocation2 + $0xc0] sm:$0xff] }
  0x10   :  { %v319_v25 = vld [vmem:[#allocation2 + $0xf8] sm:$0xff]  ;;  %v337_v31 = vld [vmem:[#allocation2 + $0x188] sm:$0xff]  ;;  %v310_v34 = vld [vmem:[#allocation2 + $0xb0] sm:$0xff] }
  0x11   :  { %206 = vmatpush.msrb.mxu1 %v66_v7  ;;  %488 = vmatpush.msrb.mxu0 %v319_v25  ;;  %v315_v29 = vld [vmem:[#allocation2 + $0xd8] sm:$0xff]  ;;  %v313_v33 = vld [vmem:[#allocation2 + $0xc8] sm:$0xff]  ;;  %v308_v36 = vld [vmem:[#allocation2 + $0xa0] sm:$0xff] }
  0x12   :  { %359 = vmatpush.msrb.mxu2 %v316_v26  ;;  %v1414_v30 = vld [vmem:[%s1712_s0 + $0x58] sm:$0xff]  ;;  %v309_v37 = vld [vmem:[#allocation2 + $0xa8] sm:$0xff]  ;;  %v306_v38 = vld [vmem:[#allocation2 + $0x90] sm:$0xff] }
  0x13   :  { %553 = vmatpush.msra.mxu1 %v351_v12  ;;  %489 = vmatpush.msrb.mxu0 %v317_v27  ;;  %v311_v35 = vld [vmem:[#allocation2 + $0xb8] sm:$0xff]  ;;  %v1422_v40 = vld [vmem:[%s1712_s0 + $0x60] sm:$0xff]  ;;  %v305_v43 = vld [vmem:[#allocation2 + $0x88] sm:$0xff] }
  0x14   :  { %1058 = vmatmul.msk.f32.gmra.mxu0 %vm77_vm0, %v50_v8  ;;  %1062 = vmatmul.msk.f32.gmra.mxu1 %vm77_vm0, %v54_v9  ;;  %v307_v39 = vld [vmem:[#allocation2 + $0x98] sm:$0xff]  ;;  %v304_v42 = vld [vmem:[#allocation2 + $0x80] sm:$0xff]  ;;  %v302_v44 = vld [vmem:[#allocation2 + $0x70] sm:$0xff] }
  0x15   :  { %554 = vmatpush.msra.mxu1 %v349_v15  ;;  %360 = vmatpush.msrb.mxu2 %v314_v28  ;;  %v335_v41 = vld [vmem:[#allocation2 + $0x178] sm:$0xff]  ;;  %v300_v46 = vld [vmem:[#allocation2 + $0x60] sm:$0xff]  ;;  %v301_v47 = vld [vmem:[#allocation2 + $0x68] sm:$0xff] }
  0x16   :  { %1067 = vmatmul.msk.f32.gmra.mxu2 %vm77_vm0, %v1406_v22  ;;  %490 = vmatpush.msrb.mxu0 %v315_v29  ;;  %v303_v45 = vld [vmem:[#allocation2 + $0x78] sm:$0xff]  ;;  %v298_v48 = vld [vmem:[#allocation2 + $0x50] sm:$0xff]  ;;  %v296_v50 = vld [vmem:[#allocation2 + $0x40] sm:$0xff] }
  0x17   :  { %555 = vmatpush.msra.mxu1 %v347_v17  ;;  %361 = vmatpush.msrb.mxu2 %v312_v32  ;;  %v299_v49 = vld [vmem:[#allocation2 + $0x58] sm:$0xff]  ;;  %v297_v51 = vld [vmem:[#allocation2 + $0x48] sm:$0xff]  ;;  %v294_v53 = vld [vmem:[#allocation2 + $0x30] sm:$0xff] }
  0x18   :  { %491 = vmatpush.msrb.mxu0 %v313_v33  ;;  %v1431_v52 = vld [vmem:[%s1712_s0 + $0x68] sm:$0xff]  ;;  %v295_v54 = vld [vmem:[#allocation2 + $0x38] sm:$0xff]  ;;  %v292_v56 = vld [vmem:[#allocation2 + $0x20] sm:$0xff] }
  0x19   :  { %556 = vmatpush.msra.mxu1 %v345_v18  ;;  %362 = vmatpush.msrb.mxu2 %v310_v34  ;;  %v333_v55 = vld [vmem:[#allocation2 + $0x168] sm:$0xff]  ;;  %v290_v58 = vld [vmem:[#allocation2 + $0x10] sm:$0xff]  ;;  %v291_v59 = vld [vmem:[#allocation2 + $0x18] sm:$0xff] }
  0x1a   :  { %492 = vmatpush.msrb.mxu0 %v311_v35  ;;  %v293_v57 = vld [vmem:[#allocation2 + $0x28] sm:$0xff]  ;;  %v288_v60 = vld [vmem:[#allocation2] sm:$0xff]  ;;  %v331_v62 = vld [vmem:[#allocation2 + $0x158] sm:$0xff] }
  0x1b   :  { %557 = vmatpush.msra.mxu1 %v343_v19  ;;  %363 = vmatpush.msrb.mxu2 %v308_v36  ;;  %v289_v61 = vld [vmem:[#allocation2 + $0x8] sm:$0xff]  ;;  %v1444_v63 = vld [vmem:[%s1712_s0 + $0x70] sm:$0xff]  ;;  %v348_v2 = vld [vmem:[#allocation2 + $0x1e0] sm:$0xff] }
  0x1c   :  { %1059 = vmatmul.msk.f32.gmra.mxu0 %vm77_vm0, %v51_v10  ;;  %1063 = vmatmul.msk.f32.gmra.mxu1 %vm77_vm0, %v1369_v11  ;;  %v350_v0 = vld [vmem:[#allocation2 + $0x1f0] sm:$0xff]  ;;  %v329_v1 = vld [vmem:[#allocation2 + $0x148] sm:$0xff]  ;;  %v1451_v5 = vld [vmem:[%s1714_s2] sm:$0x3] }
  0x1d   :  { %558 = vmatpush.msra.mxu1 %v341_v21  ;;  %493 = vmatpush.msrb.mxu0 %v309_v37  ;;  %v1458_v6 = vld [vmem:[%s1712_s0 + $0x78] sm:$0xff]  ;;  %v342_v7 = vld [vmem:[#allocation2 + $0x1b0] sm:$0xff]  ;;  %v336_v15 = vld [vmem:[#allocation2 + $0x180] sm:$0xff] }
  0x1e   :  { %1068 = vmatmul.msk.f32.gmra.mxu2 %vm77_vm0, %v1414_v30  ;;  %1071 = vmatmul.msk.f32.vlgmr.msra.gmra.mxu3 %vm77_vm0, %v1444_v63  ;;  %v334_v17 = vld [vmem:[#allocation2 + $0x170] sm:$0xff]  ;;  %v332_v18 = vld [vmem:[#allocation2 + $0x160] sm:$0xff]  ;;  %v323_v25 = vld [vmem:[#allocation2 + $0x118] sm:$0xff] }
  0x1f   :  { %559 = vmatpush.msra.mxu1 %v339_v23  ;;  %364 = vmatpush.msrb.mxu2 %v306_v38  ;;  %v330_v19 = vld [vmem:[#allocation2 + $0x150] sm:$0xff]  ;;  %v328_v24 = vld [vmem:[#allocation2 + $0x140] sm:$0xff]  ;;  %v321_v34 = vld [vmem:[#allocation2 + $0x108] sm:$0xff] }
  0x20   :  { %494 = vmatpush.msrb.mxu0 %v307_v39  ;;  %423 = vmatpush.msrb.mxu3 %v350_v0  ;;  %v326_v26 = vld [vmem:[#allocation2 + $0x130] sm:$0xff]  ;;  %v324_v27 = vld [vmem:[#allocation2 + $0x120] sm:$0xff]  ;;  %v729_v39 = vld [vmem:[%s1717_s5 + $0x78] sm:$0xff] }
  0x21   :  { %560 = vmatpush.msra.mxu1 %v337_v31  ;;  %365 = vmatpush.msrb.mxu2 %v304_v42  ;;  %v322_v28 = vld [vmem:[#allocation2 + $0x110] sm:$0xff]  ;;  %v320_v33 = vld [vmem:[#allocation2 + $0x100] sm:$0xff] }
  0x22   :  { %495 = vmatpush.msrb.mxu0 %v305_v43  ;;  %424 = vmatpush.msrb.mxu3 %v348_v2  ;;  %v741_v2 = vld [vmem:[%s1717_s5 + $0xd8] sm:$0xff] }
  0x23   :  { %561 = vmatpush.msra.mxu1 %v335_v41  ;;  %366 = vmatpush.msrb.mxu2 %v302_v44  ;;  %v728_v44 = vld [vmem:[%s1717_s5 + $0x70] sm:$0xff] }
  0x24   :  { %1060 = vmatmul.msk.f32.gmra.mxu0 %vm77_vm0, %v52_v13  ;;  %1064 = vmatmul.msk.f32.gmra.mxu1 %vm77_vm0, %v1380_v14 }
  0x25   :  { %496 = vmatpush.msrb.mxu0 %v303_v45  ;;  %367 = vmatpush.msrb.mxu2 %v300_v46  ;;  %v744_v45 = vld [vmem:[%s1717_s5 + $0xf0] sm:$0xff]  ;;  %v1493_v46 = vperm.slane %v1451_v5, 1 }
  0x26   :  { %1069 = vmatmul.msk.f32.gmra.mxu2 %vm77_vm0, %v1422_v40  ;;  %562 = vmatpush.msra.mxu1 %v333_v55 }
  0x27   :  { %497 = vmatpush.msrb.mxu0 %v301_v47  ;;  %368 = vmatpush.msrb.mxu2 %v298_v48 }
  0x28   :  { %563 = vmatpush.msra.mxu1 %v331_v62  ;;  %1072 = vmatmul.msk.f32.gmra.mxu3 %vm77_vm0, %v1458_v6 }
  0x29   :  { %498 = vmatpush.msrb.mxu0 %v299_v49  ;;  %369 = vmatpush.msrb.mxu2 %v296_v50 }
  0x2a   :  { %564 = vmatpush.msra.mxu1 %v329_v1  ;;  %v725_v1 = vld [vmem:[%s1717_s5 + $0x58] sm:$0xff] }
  0x2b   :  { %499 = vmatpush.msrb.mxu0 %v297_v51  ;;  %370 = vmatpush.msrb.mxu2 %v294_v53  ;;  %v727_v51 = vld [vmem:[%s1717_s5 + $0x68] sm:$0xff] }
  0x2c   :  { %1065 = vmatmul.msk.f32.gmra.mxu1 %vm77_vm0, %v1388_v16 }
  0x2d   :  { %500 = vmatpush.msrb.mxu0 %v295_v54  ;;  %371 = vmatpush.msrb.mxu2 %v292_v56 }
  0x2e   :  { %1070 = vmatmul.msk.f32.gmra.mxu2 %vm77_vm0, %v1431_v52 }
  0x2f   :  { %501 = vmatpush.msrb.mxu0 %v293_v57  ;;  %372 = vmatpush.msrb.mxu2 %v290_v58  ;;  %v726_v58 = vld [vmem:[%s1717_s5 + $0x60] sm:$0xff] }
  0x31   :  { %502 = vmatpush.msrb.mxu0 %v291_v59  ;;  %373 = vmatpush.msrb.mxu2 %v288_v60  ;;  %v742_v59 = vld [vmem:[%s1717_s5 + $0xe0] sm:$0xff] }
  0x33   :  { %503 = vmatpush.msrb.mxu0 %v289_v61  ;;  %750 = vmatpush.msra.mxu2 %v729_v39 }
  0x34   :  { %1073 = vmatmul.msk.f32.vlgmr.msrb.gmra.mxu1 %vm77_vm0, %v49_v3  ;;  %v346_v3 = vld [vmem:[#allocation2 + $0x1d0] sm:$0xff] }
  0x35   :  { %425 = vmatpush.msrb.mxu3 %v346_v3  ;;  %751 = vmatpush.msra.mxu2 %v728_v44 }
  0x37   :  { %752 = vmatpush.msra.mxu2 %v727_v51  ;;  %v735_v51 = vld [vmem:[%s1717_s5 + $0xa8] sm:$0xff] }
  0x39   :  { %753 = vmatpush.msra.mxu2 %v726_v58 }
  0x3b   :  { %754 = vmatpush.msra.mxu2 %v725_v1 }
  0x3c   :  { %1074 = vmatmul.msk.f32.gmra.mxu1 %vm77_vm0, %v50_v8  ;;  %v327_v8 = vld [vmem:[#allocation2 + $0x138] sm:$0xff] }
  0x3d   :  { %565 = vmatpush.msra.mxu1 %v327_v8  ;;  %v724_v8 = vld [vmem:[%s1717_s5 + $0x50] sm:$0xff] }
  0x3e   :  { %755 = vmatpush.msra.mxu2 %v724_v8  ;;  %v732_v8 = vld [vmem:[%s1717_s5 + $0x90] sm:$0xff] }
  0x44   :  { %1075 = vmatmul.msk.f32.gmra.mxu1 %vm77_vm0, %v51_v10  ;;  %v1463_v10 = vperm.slane %v1451_v5, 0 }
  0x4c   :  { %1076 = vmatmul.msk.f32.gmra.mxu1 %vm77_vm0, %v52_v13 }
  0x54   :  { %1077 = vmatmul.msk.f32.gmra.mxu1 %vm77_vm0, %v53_v4  ;;  %v344_v4 = vld [vmem:[#allocation2 + $0x1c0] sm:$0xff] }
  0x55   :  { %426 = vmatpush.msrb.mxu3 %v344_v4 }
  0x57   :  { %427 = vmatpush.msrb.mxu3 %v342_v7 }
  0x5c   :  { %1078 = vmatmul.msk.f32.gmra.mxu1 %vm77_vm0, %v54_v9  ;;  %v340_v9 = vld [vmem:[#allocation2 + $0x1a0] sm:$0xff] }
  0x5d   :  { %428 = vmatpush.msrb.mxu3 %v340_v9 }
  0x64   :  { %1079 = vmatmul.msk.f32.gmra.mxu1 %vm77_vm0, %v1369_v11  ;;  %v338_v11 = vld [vmem:[#allocation2 + $0x190] sm:$0xff] }
  0x65   :  { %429 = vmatpush.msrb.mxu3 %v338_v11  ;;  %v740_v11 = vld [vmem:[%s1717_s5 + $0xd0] sm:$0xff] }
  0x67   :  { %430 = vmatpush.msrb.mxu3 %v336_v15 }
  0x69   :  { %431 = vmatpush.msrb.mxu3 %v334_v17  ;;  %v723_v17 = vld [vmem:[%s1717_s5 + $0x48] sm:$0xff] }
  0x6a   :  { %756 = vmatpush.msra.mxu2 %v723_v17 }
  0x6b   :  { %432 = vmatpush.msrb.mxu3 %v332_v18 }
  0x6c   :  { %1080 = vmatmul.msk.f32.gmra.mxu1 %vm77_vm0, %v1380_v14 }
  0x6d   :  { %433 = vmatpush.msrb.mxu3 %v330_v19  ;;  %v739_v19 = vld [vmem:[%s1717_s5 + $0xc8] sm:$0xff] }
  0x6f   :  { %434 = vmatpush.msrb.mxu3 %v328_v24 }
  0x71   :  { %435 = vmatpush.msrb.mxu3 %v326_v26 }
  0x73   :  { %436 = vmatpush.msrb.mxu3 %v324_v27  ;;  %v738_v27 = vld [vmem:[%s1717_s5 + $0xc0] sm:$0xff] }
  0x74   :  { %1081 = vmatmul.msk.f32.gmra.mxu1 %vm77_vm0, %v1388_v16  ;;  %v325_v16 = vld [vmem:[#allocation2 + $0x128] sm:$0xff] }
  0x75   :  { %566 = vmatpush.msra.mxu1 %v325_v16  ;;  %437 = vmatpush.msrb.mxu3 %v322_v28 }
  0x77   :  { %567 = vmatpush.msra.mxu1 %v323_v25  ;;  %438 = vmatpush.msrb.mxu3 %v320_v33  ;;  %v722_v25 = vld [vmem:[%s1717_s5 + $0x40] sm:$0xff]  ;;  %v721_v33 = vld [vmem:[%s1717_s5 + $0x38] sm:$0xff] }
  0x78   :  { %757 = vmatpush.msra.mxu2 %v722_v25 }
  0x79   :  { %568 = vmatpush.msra.mxu1 %v321_v34  ;;  %v737_v34 = vld [vmem:[%s1717_s5 + $0xb8] sm:$0xff] }
  0x7a   :  { %758 = vmatpush.msra.mxu2 %v721_v33 }
  0x7c   :  { %1082 = vmatmul.msk.f32.gmra.mxu1 %vm77_vm0, %v1398_v20 }
  0x84   :  { %1083 = vmatmul.msk.f32.gmra.mxu1 %vm77_vm0, %v1406_v22 }
  0x89   :  { %v143_v12 = vpop.f32.mrf.mxu0  ;;  %v155_v13 = vpop.f32.mrf.mxu1 }
  0x8a   :  { %v144_v14 = vadd.f32 %v143_v12, %v1463_v10  ;;  %v156_v41 = vadd.f32 %v155_v13, %v1463_v10 }
  0x8c   :  { %1122 = vtanh.f32 %v144_v14  ;;  %1084 = vmatmul.msk.f32.gmra.mxu1 %vm77_vm0, %v1414_v30 }
  0x91   :  { %v146_v20 = vpop.f32.mrf.mxu0  ;;  %v158_v21 = vpop.f32.mrf.mxu1 }
  0x92   :  { %v1123_v22 = vpop.eup %1122  ;;  %v147_v23 = vadd.f32 %v146_v20, %v1463_v10  ;;  %v159_v47 = vadd.f32 %v158_v21, %v1463_v10  ;;  %v170_v9 = vpop.f32.mrf.mxu2 }
  0x93   :  { %374 = vmatmul.f32.vlgmr.msrb.gmra.mxu2 %v1123_v22  ;;  %504 = vmatmul.f32.vlgmr.msrb.gmra.mxu0 %v1123_v22  ;;  %v171_v12 = vadd.f32 %v170_v9, %v1463_v10 }
  0x94   :  { %1124 = vtanh.f32 %v147_v23  ;;  %1085 = vmatmul.msk.f32.gmra.mxu1 %vm77_vm0, %v1422_v40  ;;  %v745_v40 = vld [vmem:[%s1717_s5 + $0xf8] sm:$0xff] }
  0x95   :  { %815 = vmatpush.msra.mxu3 %v745_v40 }
  0x97   :  { %816 = vmatpush.msra.mxu3 %v744_v45 }
  0x99   :  { %v149_v29 = vpop.f32.mrf.mxu0  ;;  %v161_v30 = vpop.f32.mrf.mxu1 }
  0x9a   :  { %v1125_v31 = vpop.eup %1124  ;;  %v150_v32 = vadd.f32 %v149_v29, %v1463_v10  ;;  %v162_v53 = vadd.f32 %v161_v30, %v1463_v10  ;;  %v173_v18 = vpop.f32.mrf.mxu2 }
  0x9b   :  { %377 = vmatmul.f32.gmra.mxu2 %v1125_v31  ;;  %507 = vmatmul.f32.gmra.mxu0 %v1125_v31  ;;  %v174_v20 = vadd.f32 %v173_v18, %v1463_v10 }
  0x9c   :  { %1126 = vtanh.f32 %v150_v32  ;;  %1086 = vmatmul.msk.f32.gmra.mxu1 %vm77_vm0, %v1431_v52  ;;  %v743_v52 = vld [vmem:[%s1717_s5 + $0xe8] sm:$0xff] }
  0x9d   :  { %817 = vmatpush.msra.mxu3 %v743_v52 }
  0x9f   :  { %818 = vmatpush.msra.mxu3 %v742_v59 }
  0xa1   :  { %v152_v35 = vpop.f32.mrf.mxu0  ;;  %v164_v36 = vpop.f32.mrf.mxu1  ;;  %819 = vmatpush.msra.mxu3 %v741_v2 }
  0xa2   :  { %v1127_v37 = vpop.eup %1126  ;;  %v153_v38 = vadd.f32 %v152_v35, %v1463_v10  ;;  %v165_v60 = vadd.f32 %v164_v36, %v1463_v10  ;;  %v176_v26 = vpop.f32.mrf.mxu2 }
  0xa3   :  { %380 = vmatmul.f32.gmra.mxu2 %v1127_v37  ;;  %510 = vmatmul.f32.gmra.mxu0 %v1127_v37  ;;  %v177_v28 = vadd.f32 %v176_v26, %v1463_v10  ;;  %v185_v58 = vpop.f32.mrf.mxu3 }
  0xa4   :  { %1128 = vtanh.f32 %v153_v38  ;;  %1087 = vmatmul.msk.f32.gmra.mxu1 %vm77_vm0, %v1444_v63  ;;  %820 = vmatpush.msra.mxu3 %v740_v11 }
  0xa5   :  { %1130 = vtanh.f32 %v156_v41  ;;  %v720_v41 = vld [vmem:[%s1717_s5 + $0x30] sm:$0xff] }
  0xa6   :  { %1132 = vtanh.f32 %v159_v47  ;;  %821 = vmatpush.msra.mxu3 %v739_v19  ;;  %759 = vmatpush.msra.mxu2 %v720_v41 }
  0xa8   :  { %822 = vmatpush.msra.mxu3 %v738_v27 }
  0xa9   :  { %v167_v42 = vpop.f32.mrf.mxu1 }
  0xaa   :  { %v1129_v43 = vpop.eup %1128  ;;  %v168_v3 = vadd.f32 %v167_v42, %v1463_v10  ;;  %v179_v35 = vpop.f32.mrf.mxu2  ;;  %823 = vmatpush.msra.mxu3 %v737_v34  ;;  %v736_v42 = vld [vmem:[%s1717_s5 + $0xb0] sm:$0xff]  ;;  %v903_v34 = vld [vmem:[%s1719_s7 + $0x38] sm:$0xff] }
  0xab   :  { %383 = vmatmul.f32.gmra.mxu2 %v1129_v43  ;;  %513 = vmatmul.f32.gmra.mxu0 %v1129_v43  ;;  %v1131_v49 = vpop.eup %1130  ;;  %v180_v36 = vadd.f32 %v179_v35, %v1463_v10  ;;  %v188_v1 = vpop.f32.mrf.mxu3 }
  0xac   :  { %1088 = vmatmul.msk.f32.gmra.mxu1 %vm77_vm0, %v1458_v6  ;;  %v1133_v54 = vpop.eup %1132  ;;  %824 = vmatpush.msra.mxu3 %v736_v42 }
  0xad   :  { %965 = vmatpush.msra.mxu0 %v903_v34 }
  0xae   :  { %825 = vmatpush.msra.mxu3 %v735_v51 }
  0xb1   :  { %v208_v48 = vpop.f32.mrf.mxu1 }
  0xb2   :  { %v209_v50 = vadd.f32 %v208_v48, %v1493_v46  ;;  %v182_v43 = vpop.f32.mrf.mxu2 }
  0xb3   :  { %386 = vmatmul.f32.gmra.mxu2 %v1131_v49  ;;  %516 = vmatmul.f32.gmra.mxu0 %v1131_v49  ;;  %v183_v45 = vadd.f32 %v182_v43, %v1463_v10 }
  0xb4   :  { %1134 = vtanh.f32 %v209_v50  ;;  %v719_v50 = vld [vmem:[%s1717_s5 + $0x28] sm:$0xff] }
  0xb5   :  { %1136 = vtanh.f32 %v162_v53  ;;  %760 = vmatpush.msra.mxu2 %v719_v50 }
  0xb9   :  { %v211_v55 = vpop.f32.mrf.mxu1 }
  0xba   :  { %v1135_v56 = vpop.eup %1134  ;;  %v212_v57 = vadd.f32 %v211_v55, %v1493_v46 }
  0xbb   :  { %389 = vmatmul.f32.gmra.mxu2 %v1133_v54  ;;  %439 = vmatmul.f32.vlgmr.msrb.gmra.mxu3 %v1135_v56  ;;  %v1137_v61 = vpop.eup %1136 }
  0xbc   :  { %1138 = vtanh.f32 %v212_v57  ;;  %519 = vmatmul.f32.gmra.mxu0 %v1133_v54  ;;  %569 = vmatmul.f32.vlgmr.msra.gmra.mxu1 %v1135_v56  ;;  %v718_v56 = vld [vmem:[%s1717_s5 + $0x20] sm:$0xff] }
  0xbd   :  { %1140 = vtanh.f32 %v165_v60  ;;  %761 = vmatpush.msra.mxu2 %v718_v56  ;;  %v734_v57 = vld [vmem:[%s1717_s5 + $0xa0] sm:$0xff]  ;;  %v186_v60 = vadd.f32 %v185_v58, %v1463_v10 }
  0xbe   :  { %826 = vmatpush.msra.mxu3 %v734_v57 }
  0xc1   :  { %v214_v62 = vpop.f32.mrf.mxu1 }
  0xc2   :  { %v1139_v63 = vpop.eup %1138  ;;  %v215_v0 = vadd.f32 %v214_v62, %v1493_v46 }
  0xc3   :  { %392 = vmatmul.f32.gmra.mxu2 %v1137_v61  ;;  %442 = vmatmul.f32.gmra.mxu3 %v1139_v63  ;;  %v1141_v4 = vpop.eup %1140 }
  0xc4   :  { %1142 = vtanh.f32 %v215_v0  ;;  %522 = vmatmul.f32.gmra.mxu0 %v1137_v61  ;;  %572 = vmatmul.f32.gmra.mxu1 %v1139_v63  ;;  %v717_v63 = vld [vmem:[%s1717_s5 + $0x18] sm:$0xff] }
  0xc5   :  { %1144 = vtanh.f32 %v168_v3  ;;  %762 = vmatpush.msra.mxu2 %v717_v63  ;;  %v733_v0 = vld [vmem:[%s1717_s5 + $0x98] sm:$0xff] }
  0xc6   :  { %827 = vmatpush.msra.mxu3 %v733_v0 }
  0xc8   :  { %828 = vmatpush.msra.mxu3 %v732_v8 }
  0xc9   :  { %v217_v5 = vpop.f32.mrf.mxu1 }
  0xca   :  { %v1143_v6 = vpop.eup %1142  ;;  %v218_v7 = vadd.f32 %v217_v5, %v1493_v46 }
  0xcb   :  { %395 = vmatmul.f32.gmra.mxu2 %v1141_v4  ;;  %445 = vmatmul.f32.gmra.mxu3 %v1143_v6  ;;  %v1145_v13 = vpop.eup %1144 }
  0xcc   :  { %1146 = vtanh.f32 %v218_v7  ;;  %525 = vmatmul.f32.gmra.mxu0 %v1141_v4  ;;  %575 = vmatmul.f32.gmra.mxu1 %v1143_v6  ;;  %v189_v4 = vadd.f32 %v188_v1, %v1463_v10  ;;  %v716_v7 = vld [vmem:[%s1717_s5 + $0x10] sm:$0xff] }
  0xcd   :  { %1148 = vtanh.f32 %v171_v12  ;;  %763 = vmatpush.msra.mxu2 %v716_v7 }
  0xd1   :  { %v220_v14 = vpop.f32.mrf.mxu1 }
  0xd2   :  { %v1147_v15 = vpop.eup %1146  ;;  %v221_v16 = vadd.f32 %v220_v14, %v1493_v46 }
  0xd3   :  { %398 = vmatmul.f32.gmra.mxu2 %v1145_v13  ;;  %448 = vmatmul.f32.gmra.mxu3 %v1147_v15  ;;  %v1149_v21 = vpop.eup %1148 }
  0xd4   :  { %1150 = vtanh.f32 %v221_v16  ;;  %528 = vmatmul.f32.gmra.mxu0 %v1145_v13  ;;  %578 = vmatmul.f32.gmra.mxu1 %v1147_v15  ;;  %v715_v13 = vld [vmem:[%s1717_s5 + $0x8] sm:$0xff] }
  0xd5   :  { %1152 = vtanh.f32 %v174_v20  ;;  %764 = vmatpush.msra.mxu2 %v715_v13  ;;  %v731_v15 = vld [vmem:[%s1717_s5 + $0x88] sm:$0xff]  ;;  %v714_v20 = vld [vmem:[%s1717_s5] sm:$0xff] }
  0xd6   :  { %829 = vmatpush.msra.mxu3 %v731_v15 }
  0xd7   :  { %765 = vmatpush.msra.mxu2 %v714_v20 }
  0xd9   :  { %v223_v22 = vpop.f32.mrf.mxu1 }
  0xda   :  { %v1151_v23 = vpop.eup %1150  ;;  %v224_v24 = vadd.f32 %v223_v22, %v1493_v46 }
  0xdb   :  { %451 = vmatmul.f32.gmra.mxu3 %v1151_v23  ;;  %401 = vmatmul.f32.gmra.mxu2 %v1149_v21  ;;  %v1153_v29 = vpop.eup %1152 }
  0xdc   :  { %1154 = vtanh.f32 %v224_v24  ;;  %581 = vmatmul.f32.gmra.mxu1 %v1151_v23  ;;  %531 = vmatmul.f32.gmra.mxu0 %v1149_v21  ;;  %v730_v21 = vld [vmem:[%s1717_s5 + $0x80] sm:$0xff] }
  0xdd   :  { %1156 = vtanh.f32 %v177_v28  ;;  %830 = vmatpush.msra.mxu3 %v730_v21 }
  0xe1   :  { %v226_v30 = vpop.f32.mrf.mxu1 }
  0xe2   :  { %v1155_v31 = vpop.eup %1154  ;;  %v227_v32 = vadd.f32 %v226_v30, %v1493_v46 }
  0xe3   :  { %454 = vmatmul.f32.gmra.mxu3 %v1155_v31  ;;  %404 = vmatmul.f32.gmra.mxu2 %v1153_v29  ;;  %v1157_v37 = vpop.eup %1156 }
  0xe4   :  { %1158 = vtanh.f32 %v227_v32  ;;  %584 = vmatmul.f32.gmra.mxu1 %v1155_v31  ;;  %534 = vmatmul.f32.gmra.mxu0 %v1153_v29  ;;  %v352_v32 = vld [vmem:[%s1716_s4] sm:$0x3] }
  0xe5   :  { %1160 = vtanh.f32 %v180_v36  ;;  %v1612_v35 = vperm.slane %v352_v32, 1 }
  0xe9   :  { %v229_v38 = vpop.f32.mrf.mxu1 }
  0xea   :  { %v1159_v39 = vpop.eup %1158  ;;  %v230_v40 = vadd.f32 %v229_v38, %v1493_v46 }
  0xeb   :  { %457 = vmatmul.f32.gmra.mxu3 %v1159_v39  ;;  %407 = vmatmul.f32.gmra.mxu2 %v1157_v37  ;;  %v1161_v44 = vpop.eup %1160 }
  0xec   :  { %1162 = vtanh.f32 %v230_v40  ;;  %587 = vmatmul.f32.gmra.mxu1 %v1159_v39  ;;  %537 = vmatmul.f32.gmra.mxu0 %v1157_v37  ;;  %v1615_v37 = vperm.slane %v352_v32, 0 }
  0xed   :  { %1164 = vtanh.f32 %v183_v45 }
  0xf1   :  { %v232_v47 = vpop.f32.mrf.mxu1 }
  0xf2   :  { %v1163_v48 = vpop.eup %1162  ;;  %v233_v49 = vadd.f32 %v232_v47, %v1493_v46 }
  0xf3   :  { %460 = vmatmul.f32.gmra.mxu3 %v1163_v48  ;;  %410 = vmatmul.f32.gmra.mxu2 %v1161_v44  ;;  %v1165_v52 = vpop.eup %1164 }
  0xf4   :  { %1166 = vtanh.f32 %v233_v49  ;;  %590 = vmatmul.f32.gmra.mxu1 %v1163_v48  ;;  %540 = vmatmul.f32.gmra.mxu0 %v1161_v44 }
  0xf9   :  { %v235_v53 = vpop.f32.mrf.mxu1 }
  0xfa   :  { %v1167_v54 = vpop.eup %1166  ;;  %v236_v55 = vadd.f32 %v235_v53, %v1493_v46 }
  0xfb   :  { %463 = vmatmul.f32.gmra.mxu3 %v1167_v54  ;;  %413 = vmatmul.f32.gmra.mxu2 %v1165_v52 }
  0xfc   :  { %1168 = vtanh.f32 %v236_v55  ;;  %593 = vmatmul.f32.gmra.mxu1 %v1167_v54  ;;  %543 = vmatmul.f32.gmra.mxu0 %v1165_v52  ;;  %v902_v52 = vld [vmem:[%s1719_s7 + $0x30] sm:$0xff] }
  0xfd   :  { %1170 = vtanh.f32 %v186_v60  ;;  %966 = vmatpush.msra.mxu0 %v902_v52 }
 0x101   :  { %v238_v59 = vpop.f32.mrf.mxu1 }
 0x102   :  { %v1169_v61 = vpop.eup %1168  ;;  %v239_v62 = vadd.f32 %v238_v59, %v1493_v46 }
 0x103   :  { %466 = vmatmul.f32.gmra.mxu3 %v1169_v61  ;;  %v1171_v2 = vpop.eup %1170 }
 0x104   :  { %1172 = vtanh.f32 %v239_v62  ;;  %596 = vmatmul.f32.gmra.mxu1 %v1169_v61  ;;  %416 = vmatmul.f32.gmra.mxu2 %v1171_v2 }
 0x105   :  { %546 = vmatmul.f32.gmra.mxu0 %v1171_v2  ;;  %1174 = vtanh.f32 %v189_v4 }
 0x109   :  { %v241_v3 = vpop.f32.mrf.mxu1 }
 0x10a   :  { %v1173_v5 = vpop.eup %1172  ;;  %v242_v6 = vadd.f32 %v241_v3, %v1493_v46 }
 0x10b   :  { %469 = vmatmul.f32.gmra.mxu3 %v1173_v5  ;;  %v1175_v10 = vpop.eup %1174 }
 0x10c   :  { %1176 = vtanh.f32 %v242_v6  ;;  %599 = vmatmul.f32.gmra.mxu1 %v1173_v5  ;;  %419 = vmatmul.f32.gmra.mxu2 %v1175_v10 }
 0x10d   :  { %549 = vmatmul.f32.gmra.mxu0 %v1175_v10 }
 0x110   :  { %v505_v14 = vpop.f32.mrf.mxu0 }
 0x111   :  { %v244_v9 = vpop.f32.mrf.mxu1  ;;  %v506_v36 = vadd.f32 %v505_v14, %v1612_v35 }
 0x112   :  { %v1177_v11 = vpop.eup %1176  ;;  %v245_v12 = vadd.f32 %v244_v9, %v1493_v46 }
 0x113   :  { %472 = vmatmul.f32.gmra.mxu3 %v1177_v11 }
 0x114   :  { %1178 = vtanh.f32 %v245_v12  ;;  %602 = vmatmul.f32.gmra.mxu1 %v1177_v11 }
 0x116   :  { %v375_v19 = vpop.f32.mrf.mxu2 }
 0x117   :  { %v376_v41 = vadd.f32 %v375_v19, %v1615_v37 }
 0x118   :  { %v508_v22 = vpop.f32.mrf.mxu0 }
 0x119   :  { %v247_v16 = vpop.f32.mrf.mxu1  ;;  %v509_v43 = vadd.f32 %v508_v22, %v1612_v35 }
 0x11a   :  { %v1179_v17 = vpop.eup %1178  ;;  %v248_v18 = vadd.f32 %v247_v16, %v1493_v46  ;;  %v901_v16 = vld [vmem:[%s1719_s7 + $0x28] sm:$0xff] }
 0x11b   :  { %475 = vmatmul.f32.gmra.mxu3 %v1179_v17  ;;  %967 = vmatpush.msra.mxu0 %v901_v16 }
 0x11c   :  { %1180 = vtanh.f32 %v248_v18  ;;  %605 = vmatmul.f32.gmra.mxu1 %v1179_v17 }
 0x11e   :  { %v378_v26 = vpop.f32.mrf.mxu2 }
 0x11f   :  { %v379_v53 = vadd.f32 %v378_v26, %v1615_v37 }
 0x120   :  { %v511_v30 = vpop.f32.mrf.mxu0 }
 0x121   :  { %v250_v23 = vpop.f32.mrf.mxu1  ;;  %v512_v57 = vadd.f32 %v511_v30, %v1612_v35 }
 0x122   :  { %v1181_v24 = vpop.eup %1180  ;;  %v251_v25 = vadd.f32 %v250_v23, %v1493_v46 }
 0x123   :  { %478 = vmatmul.f32.gmra.mxu3 %v1181_v24 }
 0x124   :  { %1182 = vtanh.f32 %v251_v25  ;;  %608 = vmatmul.f32.gmra.mxu1 %v1181_v24 }
 0x126   :  { %v381_v31 = vpop.f32.mrf.mxu2 }
 0x127   :  { %v382_v1 = vadd.f32 %v381_v31, %v1615_v37 }
 0x129   :  { %v253_v27 = vpop.f32.mrf.mxu1 }
 0x12a   :  { %v1183_v28 = vpop.eup %1182  ;;  %v254_v29 = vadd.f32 %v253_v27, %v1493_v46  ;;  %v514_v46 = vpop.f32.mrf.mxu0 }
 0x12b   :  { %481 = vmatmul.f32.gmra.mxu3 %v1183_v28  ;;  %v515_v4 = vadd.f32 %v514_v46, %v1612_v35 }
 0x12c   :  { %1184 = vtanh.f32 %v254_v29  ;;  %611 = vmatmul.f32.gmra.mxu1 %v1183_v28 }
 0x12e   :  { %v384_v39 = vpop.f32.mrf.mxu2 }
 0x12f   :  { %v385_v12 = vadd.f32 %v384_v39, %v1615_v37 }
 0x132   :  { %v1185_v33 = vpop.eup %1184  ;;  %v517_v47 = vpop.f32.mrf.mxu0 }
 0x133   :  { %484 = vmatmul.f32.gmra.mxu3 %v1185_v33  ;;  %v518_v20 = vadd.f32 %v517_v47, %v1612_v35 }
 0x134   :  { %614 = vmatmul.f32.gmra.mxu1 %v1185_v33 }
 0x136   :  { %v387_v55 = vpop.f32.mrf.mxu2 }
 0x137   :  { %v388_v27 = vadd.f32 %v387_v55, %v1615_v37 }
 0x139   :  { %v570_v38 = vpop.f32.mrf.mxu1 }
 0x13a   :  { %v571_v40 = vadd.f32 %v570_v38, %v506_v36  ;;  %v520_v61 = vpop.f32.mrf.mxu0 }
 0x13b   :  { %v521_v32 = vadd.f32 %v520_v61, %v1612_v35 }
 0x13c   :  { %vm619_vm1 = vcmp.ge.f32.partialorder %v571_v40, 0.0  ;;  %v651_v42 = vmul.f32 0.2, %v571_v40 }
 0x13e   :  { %v440_v44 = vpop.f32.mrf.mxu3  ;;  %v683_v45 = vsel %vm619_vm1, %v571_v40, %v651_v42  ;;  %v390_v5 = vpop.f32.mrf.mxu2  ;;  %v900_v40 = vld [vmem:[%s1719_s7 + $0x20] sm:$0xff] }
 0x13f   :  { %v441_v48 = vadd.f32 %v440_v44, %v376_v41  ;;  %831 = vmatmul.f32.vlgmr.msra.gmra.mxu3 %v683_v45  ;;  %v391_v41 = vadd.f32 %v390_v5, %v1615_v37  ;;  %968 = vmatpush.msra.mxu0 %v900_v40 }
 0x141   :  { %v650_v49 = vmul.f32 0.2, %v441_v48  ;;  %v573_v50 = vpop.f32.mrf.mxu1  ;;  %vm618_vm2 = vcmp.ge.f32.partialorder %v441_v48, 0.0 }
 0x142   :  { %v574_v51 = vadd.f32 %v573_v50, %v509_v43  ;;  %v523_v13 = vpop.f32.mrf.mxu0 }
 0x143   :  { %v682_v54 = vsel %vm618_vm2, %v441_v48, %v650_v49  ;;  %v524_v47 = vadd.f32 %v523_v13, %v1612_v35 }
 0x144   :  { %766 = vmatmul.f32.vlgmr.msra.gmra.mxu2 %v682_v54  ;;  %vm621_vm3 = vcmp.ge.f32.partialorder %v574_v51, 0.0  ;;  %v653_v56 = vmul.f32 0.2, %v574_v51 }
 0x146   :  { %v443_v58 = vpop.f32.mrf.mxu3  ;;  %v685_v59 = vsel %vm621_vm3, %v574_v51, %v653_v56  ;;  %v393_v21 = vpop.f32.mrf.mxu2 }
 0x147   :  { %v444_v60 = vadd.f32 %v443_v58, %v379_v53  ;;  %834 = vmatmul.f32.gmra.mxu3 %v685_v59  ;;  %v394_v54 = vadd.f32 %v393_v21, %v1615_v37 }
 0x149   :  { %v576_v62 = vpop.f32.mrf.mxu1  ;;  %vm620_vm4 = vcmp.ge.f32.partialorder %v444_v60, 0.0  ;;  %v652_v63 = vmul.f32 0.2, %v444_v60 }
 0x14a   :  { %v577_v0 = vadd.f32 %v576_v62, %v512_v57  ;;  %v526_v28 = vpop.f32.mrf.mxu0 }
 0x14b   :  { %v684_v2 = vsel %vm620_vm4, %v444_v60, %v652_v63  ;;  %v527_v59 = vadd.f32 %v526_v28, %v1612_v35 }
 0x14c   :  { %769 = vmatmul.f32.gmra.mxu2 %v684_v2  ;;  %vm623_vm5 = vcmp.ge.f32.partialorder %v577_v0, 0.0  ;;  %v655_v3 = vmul.f32 0.2, %v577_v0  ;;  %v899_v2 = vld [vmem:[%s1719_s7 + $0x18] sm:$0xff] }
 0x14d   :  { %969 = vmatpush.msra.mxu0 %v899_v2 }
 0x14e   :  { %v446_v6 = vpop.f32.mrf.mxu3  ;;  %v687_v7 = vsel %vm623_vm5, %v577_v0, %v655_v3  ;;  %v396_v46 = vpop.f32.mrf.mxu2 }
 0x14f   :  { %v447_v8 = vadd.f32 %v446_v6, %v382_v1  ;;  %837 = vmatmul.f32.gmra.mxu3 %v687_v7  ;;  %v397_v3 = vadd.f32 %v396_v46, %v1615_v37 }
 0x151   :  { %v579_v10 = vpop.f32.mrf.mxu1  ;;  %vm622_vm6 = vcmp.ge.f32.partialorder %v447_v8, 0.0  ;;  %v654_v9 = vmul.f32 0.2, %v447_v8 }
 0x152   :  { %v580_v11 = vadd.f32 %v579_v10, %v515_v4  ;;  %v529_v44 = vpop.f32.mrf.mxu0 }
 0x153   :  { %v686_v14 = vsel %vm622_vm6, %v447_v8, %v654_v9  ;;  %v530_v7 = vadd.f32 %v529_v44, %v1612_v35 }
 0x154   :  { %772 = vmatmul.f32.gmra.mxu2 %v686_v14  ;;  %vm625_vm7 = vcmp.ge.f32.partialorder %v580_v11, 0.0  ;;  %v657_v15 = vmul.f32 0.2, %v580_v11 }
 0x156   :  { %v449_v17 = vpop.f32.mrf.mxu3  ;;  %v689_v18 = vsel %vm625_vm7, %v580_v11, %v657_v15  ;;  %v399_v52 = vpop.f32.mrf.mxu2 }
 0x157   :  { %v450_v19 = vadd.f32 %v449_v17, %v385_v12  ;;  %840 = vmatmul.f32.gmra.mxu3 %v689_v18  ;;  %v400_v14 = vadd.f32 %v399_v52, %v1615_v37 }
 0x159   :  { %v582_v22 = vpop.f32.mrf.mxu1  ;;  %vm624_vm8 = vcmp.ge.f32.partialorder %v450_v19, 0.0  ;;  %v656_v23 = vmul.f32 0.2, %v450_v19 }
 0x15a   :  { %v583_v24 = vadd.f32 %v582_v22, %v518_v20  ;;  %v532_v58 = vpop.f32.mrf.mxu0 }
 0x15b   :  { %v688_v25 = vsel %vm624_vm8, %v450_v19, %v656_v23  ;;  %v533_v16 = vadd.f32 %v532_v58, %v1612_v35 }
 0x15c   :  { %775 = vmatmul.f32.gmra.mxu2 %v688_v25  ;;  %vm627_vm9 = vcmp.ge.f32.partialorder %v583_v24, 0.0  ;;  %v659_v26 = vmul.f32 0.2, %v583_v24 }
 0x15e   :  { %v452_v29 = vpop.f32.mrf.mxu3  ;;  %v691_v30 = vsel %vm627_vm9, %v583_v24, %v659_v26  ;;  %v402_v1 = vpop.f32.mrf.mxu2 }
 0x15f   :  { %v453_v31 = vadd.f32 %v452_v29, %v388_v27  ;;  %843 = vmatmul.f32.gmra.mxu3 %v691_v30  ;;  %v403_v23 = vadd.f32 %v402_v1, %v1615_v37  ;;  %v898_v27 = vld [vmem:[%s1719_s7 + $0x10] sm:$0xff] }
 0x160   :  { %970 = vmatpush.msra.mxu0 %v898_v27 }
 0x161   :  { %v585_v33 = vpop.f32.mrf.mxu1  ;;  %vm626_vm10 = vcmp.ge.f32.partialorder %v453_v31, 0.0  ;;  %v658_v34 = vmul.f32 0.2, %v453_v31 }
 0x162   :  { %v586_v36 = vadd.f32 %v585_v33, %v521_v32  ;;  %v535_v9 = vpop.f32.mrf.mxu0 }
 0x163   :  { %v690_v38 = vsel %vm626_vm10, %v453_v31, %v658_v34  ;;  %v536_v29 = vadd.f32 %v535_v9, %v1612_v35  ;;  %v896_v9 = vld [vmem:[%s1719_s7] sm:$0xff] }
 0x164   :  { %778 = vmatmul.f32.gmra.mxu2 %v690_v38  ;;  %vm629_vm11 = vcmp.ge.f32.partialorder %v586_v36, 0.0  ;;  %v661_v39 = vmul.f32 0.2, %v586_v36 }
 0x166   :  { %v455_v42 = vpop.f32.mrf.mxu3  ;;  %v693_v43 = vsel %vm629_vm11, %v586_v36, %v661_v39  ;;  %v405_v18 = vpop.f32.mrf.mxu2 }
 0x167   :  { %v456_v45 = vadd.f32 %v455_v42, %v391_v41  ;;  %846 = vmatmul.f32.gmra.mxu3 %v693_v43  ;;  %v406_v36 = vadd.f32 %v405_v18, %v1615_v37 }
 0x169   :  { %v588_v48 = vpop.f32.mrf.mxu1  ;;  %vm628_vm12 = vcmp.ge.f32.partialorder %v456_v45, 0.0  ;;  %v660_v49 = vmul.f32 0.2, %v456_v45 }
 0x16a   :  { %v589_v50 = vadd.f32 %v588_v48, %v524_v47  ;;  %v538_v25 = vpop.f32.mrf.mxu0 }
 0x16b   :  { %v692_v51 = vsel %vm628_vm12, %v456_v45, %v660_v49  ;;  %v539_v42 = vadd.f32 %v538_v25, %v1612_v35 }
 0x16c   :  { %v663_v53 = vmul.f32 0.2, %v589_v50  ;;  %781 = vmatmul.f32.gmra.mxu2 %v692_v51  ;;  %vm631_vm13 = vcmp.ge.f32.partialorder %v589_v50, 0.0 }
 0x16e   :  { %v458_v55 = vpop.f32.mrf.mxu3  ;;  %v695_v56 = vsel %vm631_vm13, %v589_v50, %v663_v53  ;;  %v408_v32 = vpop.f32.mrf.mxu2  ;;  %v897_v53 = vld [vmem:[%s1719_s7 + $0x8] sm:$0xff] }
 0x16f   :  { %v459_v57 = vadd.f32 %v458_v55, %v394_v54  ;;  %849 = vmatmul.f32.gmra.mxu3 %v695_v56  ;;  %v409_v50 = vadd.f32 %v408_v32, %v1615_v37  ;;  %971 = vmatpush.msra.mxu0 %v897_v53 }
 0x171   :  { %v591_v60 = vpop.f32.mrf.mxu1  ;;  %vm630_vm14 = vcmp.ge.f32.partialorder %v459_v57, 0.0  ;;  %v662_v61 = vmul.f32 0.2, %v459_v57  ;;  %972 = vmatpush.msra.mxu0 %v896_v9 }
 0x172   :  { %v592_v62 = vadd.f32 %v591_v60, %v527_v59  ;;  %v541_v40 = vpop.f32.mrf.mxu0 }
 0x173   :  { %v694_v63 = vsel %vm630_vm14, %v459_v57, %v662_v61  ;;  %v542_v55 = vadd.f32 %v541_v40, %v1612_v35 }
 0x174   :  { %v665_v0 = vmul.f32 0.2, %v592_v62  ;;  %784 = vmatmul.f32.gmra.mxu2 %v694_v63  ;;  %vm633_vm15 = vcmp.ge.f32.partialorder %v592_v62, 0.0 }
 0x176   :  { %v461_v4 = vpop.f32.mrf.mxu3  ;;  %v697_v5 = vsel %vm633_vm15, %v592_v62, %v665_v0  ;;  %v411_v49 = vpop.f32.mrf.mxu2 }
 0x177   :  { %v462_v6 = vadd.f32 %v461_v4, %v397_v3  ;;  %852 = vmatmul.f32.gmra.mxu3 %v697_v5  ;;  %v412_v62 = vadd.f32 %v411_v49, %v1615_v37 }
 0x179   :  { %v594_v8 = vpop.f32.mrf.mxu1  ;;  %vm632_vm0 = vcmp.ge.f32.partialorder %v462_v6, 0.0  ;;  %v664_v10 = vmul.f32 0.2, %v462_v6 }
 0x17a   :  { %v595_v11 = vadd.f32 %v594_v8, %v530_v7  ;;  %v544_v58 = vpop.f32.mrf.mxu0 }
 0x17b   :  { %v696_v12 = vsel %vm632_vm0, %v462_v6, %v664_v10  ;;  %v545_v3 = vadd.f32 %v544_v58, %v1612_v35 }
 0x17c   :  { %v667_v13 = vmul.f32 0.2, %v595_v11  ;;  %787 = vmatmul.f32.gmra.mxu2 %v696_v12  ;;  %vm635_vm1 = vcmp.ge.f32.partialorder %v595_v11, 0.0 }
 0x17e   :  { %v464_v15 = vpop.f32.mrf.mxu3  ;;  %v699_v17 = vsel %vm635_vm1, %v595_v11, %v667_v13  ;;  %v414_v1 = vpop.f32.mrf.mxu2  ;;  %vm908_vm1 = vcmask 523264  }
 0x17f   :  { %v465_v19 = vadd.f32 %v464_v15, %v400_v14  ;;  %855 = vmatmul.f32.gmra.mxu3 %v699_v17  ;;  %v415_v11 = vadd.f32 %v414_v1, %v1615_v37 }
 0x181   :  { %v666_v20 = vmul.f32 0.2, %v465_v19  ;;  %v597_v21 = vpop.f32.mrf.mxu1  ;;  %vm634_vm2 = vcmp.ge.f32.partialorder %v465_v19, 0.0 }
 0x182   :  { %v598_v22 = vadd.f32 %v597_v21, %v533_v16  ;;  %v547_v8 = vpop.f32.mrf.mxu0 }
 0x183   :  { %v698_v24 = vsel %vm634_vm2, %v465_v19, %v666_v20  ;;  %v548_v15 = vadd.f32 %v547_v8, %v1612_v35 }
 0x184   :  { %v669_v26 = vmul.f32 0.2, %v598_v22  ;;  %790 = vmatmul.f32.gmra.mxu2 %v698_v24  ;;  %vm637_vm3 = vcmp.ge.f32.partialorder %v598_v22, 0.0 }
 0x186   :  { %v467_v28 = vpop.f32.mrf.mxu3  ;;  %v701_v30 = vsel %vm637_vm3, %v598_v22, %v669_v26 }
 0x187   :  { %v468_v31 = vadd.f32 %v467_v28, %v403_v23  ;;  %858 = vmatmul.f32.gmra.mxu3 %v701_v30  ;;  %v417_v17 = vpop.f32.mrf.mxu2 }
 0x188   :  { %v418_v22 = vadd.f32 %v417_v17, %v1615_v37 }
 0x189   :  { %v668_v33 = vmul.f32 0.2, %v468_v31  ;;  %v600_v34 = vpop.f32.mrf.mxu1  ;;  %vm636_vm4 = vcmp.ge.f32.partialorder %v468_v31, 0.0 }
 0x18a   :  { %v601_v46 = vadd.f32 %v600_v34, %v536_v29  ;;  %v550_v24 = vpop.f32.mrf.mxu0 }
 0x18b   :  { %v700_v38 = vsel %vm636_vm4, %v468_v31, %v668_v33  ;;  %v551_v27 = vadd.f32 %v550_v24, %v1612_v35 }
 0x18c   :  { %v671_v39 = vmul.f32 0.2, %v601_v46  ;;  %793 = vmatmul.f32.gmra.mxu2 %v700_v38  ;;  %vm639_vm5 = vcmp.ge.f32.partialorder %v601_v46, 0.0 }
 0x18e   :  { %v470_v41 = vpop.f32.mrf.mxu3  ;;  %v703_v43 = vsel %vm639_vm5, %v601_v46, %v671_v39 }
 0x18f   :  { %v471_v44 = vadd.f32 %v470_v41, %v406_v36  ;;  %861 = vmatmul.f32.gmra.mxu3 %v703_v43  ;;  %v420_v30 = vpop.f32.mrf.mxu2  ;;  %v1672_v43 = vld [vmem:[%s1718_s6] ss:$0 sm:$0xff] }
 0x190   :  { %v421_v34 = vadd.f32 %v420_v30, %v1615_v37 }
 0x191   :  { %v670_v45 = vmul.f32 0.2, %v471_v44  ;;  %v603_v47 = vpop.f32.mrf.mxu1  ;;  %vm638_vm6 = vcmp.ge.f32.partialorder %v471_v44, 0.0 }
 0x192   :  { %v604_v48 = vadd.f32 %v603_v47, %v539_v42 }
 0x193   :  { %v702_v51 = vsel %vm638_vm6, %v471_v44, %v670_v45 }
 0x194   :  { %v673_v52 = vmul.f32 0.2, %v604_v48  ;;  %796 = vmatmul.f32.gmra.mxu2 %v702_v51  ;;  %vm641_vm7 = vcmp.ge.f32.partialorder %v604_v48, 0.0 }
 0x196   :  { %v473_v54 = vpop.f32.mrf.mxu3  ;;  %v705_v56 = vsel %vm641_vm7, %v604_v48, %v673_v52 }
 0x197   :  { %v474_v57 = vadd.f32 %v473_v54, %v409_v50  ;;  %864 = vmatmul.f32.gmra.mxu3 %v705_v56 }
 0x199   :  { %v672_v59 = vmul.f32 0.2, %v474_v57  ;;  %v606_v60 = vpop.f32.mrf.mxu1  ;;  %vm640_vm8 = vcmp.ge.f32.partialorder %v474_v57, 0.0 }
 0x19a   :  { %v607_v61 = vadd.f32 %v606_v60, %v542_v55 }
 0x19b   :  { %v704_v63 = vsel %vm640_vm8, %v474_v57, %v672_v59 }
 0x19c   :  { %v675_v0 = vmul.f32 0.2, %v607_v61  ;;  %799 = vmatmul.f32.gmra.mxu2 %v704_v63  ;;  %vm643_vm9 = vcmp.ge.f32.partialorder %v607_v61, 0.0 }
 0x19e   :  { %v476_v2 = vpop.f32.mrf.mxu3  ;;  %v707_v4 = vsel %vm643_vm9, %v607_v61, %v675_v0 }
 0x19f   :  { %v477_v5 = vadd.f32 %v476_v2, %v412_v62  ;;  %867 = vmatmul.f32.gmra.mxu3 %v707_v4 }
 0x1a1   :  { %v674_v6 = vmul.f32 0.2, %v477_v5  ;;  %v609_v7 = vpop.f32.mrf.mxu1  ;;  %vm642_vm10 = vcmp.ge.f32.partialorder %v477_v5, 0.0 }
 0x1a2   :  { %v610_v10 = vadd.f32 %v609_v7, %v545_v3 }
 0x1a3   :  { %v706_v12 = vsel %vm642_vm10, %v477_v5, %v674_v6 }
 0x1a4   :  { %v677_v13 = vmul.f32 0.2, %v610_v10  ;;  %802 = vmatmul.f32.gmra.mxu2 %v706_v12  ;;  %vm645_vm11 = vcmp.ge.f32.partialorder %v610_v10, 0.0 }
 0x1a6   :  { %v479_v14 = vpop.f32.mrf.mxu3  ;;  %v709_v16 = vsel %vm645_vm11, %v610_v10, %v677_v13 }
 0x1a7   :  { %v480_v18 = vadd.f32 %v479_v14, %v415_v11  ;;  %870 = vmatmul.f32.gmra.mxu3 %v709_v16 }
 0x1a9   :  { %v676_v19 = vmul.f32 0.2, %v480_v18  ;;  %v612_v20 = vpop.f32.mrf.mxu1  ;;  %vm644_vm12 = vcmp.ge.f32.partialorder %v480_v18, 0.0 }
 0x1aa   :  { %v613_v21 = vadd.f32 %v612_v20, %v548_v15 }
 0x1ab   :  { %v708_v23 = vsel %vm644_vm12, %v480_v18, %v676_v19 }
 0x1ac   :  { %v679_v25 = vmul.f32 0.2, %v613_v21  ;;  %805 = vmatmul.f32.gmra.mxu2 %v708_v23  ;;  %vm647_vm13 = vcmp.ge.f32.partialorder %v613_v21, 0.0 }
 0x1ae   :  { %v482_v26 = vpop.f32.mrf.mxu3  ;;  %v711_v28 = vsel %vm647_vm13, %v613_v21, %v679_v25 }
 0x1af   :  { %v483_v29 = vadd.f32 %v482_v26, %v418_v22  ;;  %873 = vmatmul.f32.gmra.mxu3 %v711_v28 }
 0x1b1   :  { %v678_v31 = vmul.f32 0.2, %v483_v29  ;;  %v615_v32 = vpop.f32.mrf.mxu1  ;;  %vm646_vm14 = vcmp.ge.f32.partialorder %v483_v29, 0.0 }
 0x1b2   :  { %v616_v33 = vadd.f32 %v615_v32, %v551_v27 }
 0x1b3   :  { %v710_v46 = vsel %vm646_vm14, %v483_v29, %v678_v31 }
 0x1b4   :  { %v681_v36 = vmul.f32 0.2, %v616_v33  ;;  %808 = vmatmul.f32.gmra.mxu2 %v710_v46  ;;  %vm649_vm15 = vcmp.ge.f32.partialorder %v616_v33, 0.0 }
 0x1b6   :  { %v485_v38 = vpop.f32.mrf.mxu3  ;;  %v713_v39 = vsel %vm649_vm15, %v616_v33, %v681_v36 }
 0x1b7   :  { %v486_v40 = vadd.f32 %v485_v38, %v421_v34  ;;  %876 = vmatmul.f32.gmra.mxu3 %v713_v39 }
 0x1b9   :  { %v680_v41 = vmul.f32 0.2, %v486_v40  ;;  %vm648_vm0 = vcmp.ge.f32.partialorder %v486_v40, 0.0 }
 0x1bb   :  { %v712_v35 = vsel %vm648_vm0, %v486_v40, %v680_v41 }
 0x1bc   :  { %811 = vmatmul.f32.gmra.mxu2 %v712_v35 }
 0x1c2   :  { %v832_v42 = vpop.f32.mrf.mxu3 }
 0x1c7   :  { %v767_v44 = vpop.f32.mrf.mxu2 }
 0x1c8   :  { %v768_v37 = vadd.f32 %v1672_v43, %v767_v44 }
 0x1ca   :  { %v833_v45 = vadd.f32 %v832_v42, %v768_v37  ;;  %v835_v47 = vpop.f32.mrf.mxu3 }
 0x1cc   :  { %1186 = vtanh.f32 %v833_v45 }
 0x1cf   :  { %v770_v48 = vpop.f32.mrf.mxu2 }
 0x1d0   :  { %v771_v49 = vadd.f32 %v1672_v43, %v770_v48 }
 0x1d2   :  { %v1187_v50 = vpop.eup %1186  ;;  %v836_v51 = vadd.f32 %v835_v47, %v771_v49  ;;  %v838_v52 = vpop.f32.mrf.mxu3 }
 0x1d3   :  { %1089 = vmatmul.msk.f32.vlgmr.msra.gmra.mxu0 %vm908_vm1, %v1187_v50 }
 0x1d4   :  { %1188 = vtanh.f32 %v836_v51 }
 0x1d7   :  { %v773_v53 = vpop.f32.mrf.mxu2 }
 0x1d8   :  { %v774_v54 = vadd.f32 %v1672_v43, %v773_v53 }
 0x1da   :  { %v1189_v55 = vpop.eup %1188  ;;  %v839_v56 = vadd.f32 %v838_v52, %v774_v54  ;;  %v841_v57 = vpop.f32.mrf.mxu3 }
 0x1db   :  { %1090 = vmatmul.msk.f32.gmra.mxu0 %vm908_vm1, %v1189_v55 }
 0x1dc   :  { %1190 = vtanh.f32 %v839_v56 }
 0x1df   :  { %v776_v58 = vpop.f32.mrf.mxu2 }
 0x1e0   :  { %v777_v59 = vadd.f32 %v1672_v43, %v776_v58 }
 0x1e2   :  { %v1191_v60 = vpop.eup %1190  ;;  %v842_v61 = vadd.f32 %v841_v57, %v777_v59  ;;  %v844_v62 = vpop.f32.mrf.mxu3 }
 0x1e3   :  { %1091 = vmatmul.msk.f32.gmra.mxu0 %vm908_vm1, %v1191_v60  ;;  %v1121_v60 = vld [vmem:[%s1720_s8] ss:$0 sm:$0xff]  ;;  %s1273_s8 = smov [#allocation5]  }
 0x1e4   :  { %1192 = vtanh.f32 %v842_v61  ;;  %s1042_s20 = sshll.u32 %s1273_s8, 4  ;;  %s1043_s20 = int_to_ptr.vmem [resolvable:$true] %s1042_s20 }
 0x1e7   :  { %v779_v63 = vpop.f32.mrf.mxu2 }
 0x1e8   :  { %v780_v0 = vadd.f32 %v1672_v43, %v779_v63 }
 0x1ea   :  { %v1193_v1 = vpop.eup %1192  ;;  %v845_v2 = vadd.f32 %v844_v62, %v780_v0  ;;  %v847_v3 = vpop.f32.mrf.mxu3 }
 0x1eb   :  { %1092 = vmatmul.msk.f32.gmra.mxu0 %vm908_vm1, %v1193_v1 }
 0x1ec   :  { %1194 = vtanh.f32 %v845_v2 }
 0x1ef   :  { %v782_v4 = vpop.f32.mrf.mxu2 }
 0x1f0   :  { %v783_v5 = vadd.f32 %v1672_v43, %v782_v4 }
 0x1f2   :  { %v1195_v6 = vpop.eup %1194  ;;  %v848_v7 = vadd.f32 %v847_v3, %v783_v5  ;;  %v850_v8 = vpop.f32.mrf.mxu3 }
 0x1f3   :  { %1093 = vmatmul.msk.f32.gmra.mxu0 %vm908_vm1, %v1195_v6 }
 0x1f4   :  { %1196 = vtanh.f32 %v848_v7 }
 0x1f7   :  { %v785_v10 = vpop.f32.mrf.mxu2 }
 0x1f8   :  { %v786_v9 = vadd.f32 %v1672_v43, %v785_v10 }
 0x1fa   :  { %v1197_v11 = vpop.eup %1196  ;;  %v851_v12 = vadd.f32 %v850_v8, %v786_v9  ;;  %v853_v13 = vpop.f32.mrf.mxu3 }
 0x1fb   :  { %1094 = vmatmul.msk.f32.gmra.mxu0 %vm908_vm1, %v1197_v11 }
 0x1fc   :  { %1198 = vtanh.f32 %v851_v12 }
 0x1ff   :  { %v788_v14 = vpop.f32.mrf.mxu2 }
 0x200   :  { %v789_v15 = vadd.f32 %v1672_v43, %v788_v14 }
 0x202   :  { %v1199_v16 = vpop.eup %1198  ;;  %v854_v17 = vadd.f32 %v853_v13, %v789_v15  ;;  %v856_v18 = vpop.f32.mrf.mxu3 }
 0x203   :  { %1095 = vmatmul.msk.f32.gmra.mxu0 %vm908_vm1, %v1199_v16 }
 0x204   :  { %1200 = vtanh.f32 %v854_v17 }
 0x207   :  { %v791_v19 = vpop.f32.mrf.mxu2 }
 0x208   :  { %v792_v20 = vadd.f32 %v1672_v43, %v791_v19 }
 0x20a   :  { %v1201_v21 = vpop.eup %1200  ;;  %v857_v22 = vadd.f32 %v856_v18, %v792_v20  ;;  %v859_v23 = vpop.f32.mrf.mxu3 }
 0x20b   :  { %1096 = vmatmul.msk.f32.gmra.mxu0 %vm908_vm1, %v1201_v21 }
 0x20c   :  { %1202 = vtanh.f32 %v857_v22 }
 0x20f   :  { %v794_v24 = vpop.f32.mrf.mxu2 }
 0x210   :  { %v795_v25 = vadd.f32 %v1672_v43, %v794_v24 }
 0x212   :  { %v1203_v26 = vpop.eup %1202  ;;  %v860_v27 = vadd.f32 %v859_v23, %v795_v25  ;;  %v862_v28 = vpop.f32.mrf.mxu3 }
 0x213   :  { %1097 = vmatmul.msk.f32.gmra.mxu0 %vm908_vm1, %v1203_v26 }
 0x214   :  { %1204 = vtanh.f32 %v860_v27 }
 0x217   :  { %v797_v29 = vpop.f32.mrf.mxu2 }
 0x218   :  { %v798_v30 = vadd.f32 %v1672_v43, %v797_v29 }
 0x21a   :  { %v1205_v31 = vpop.eup %1204  ;;  %v863_v32 = vadd.f32 %v862_v28, %v798_v30  ;;  %v865_v33 = vpop.f32.mrf.mxu3 }
 0x21b   :  { %1098 = vmatmul.msk.f32.gmra.mxu0 %vm908_vm1, %v1205_v31 }
 0x21c   :  { %1206 = vtanh.f32 %v863_v32 }
 0x21f   :  { %v800_v34 = vpop.f32.mrf.mxu2 }
 0x220   :  { %v801_v46 = vadd.f32 %v1672_v43, %v800_v34 }
 0x222   :  { %v1207_v36 = vpop.eup %1206  ;;  %v866_v38 = vadd.f32 %v865_v33, %v801_v46  ;;  %v868_v39 = vpop.f32.mrf.mxu3 }
 0x223   :  { %1099 = vmatmul.msk.f32.gmra.mxu0 %vm908_vm1, %v1207_v36 }
 0x224   :  { %1208 = vtanh.f32 %v866_v38 }
 0x227   :  { %v803_v40 = vpop.f32.mrf.mxu2 }
 0x228   :  { %v804_v41 = vadd.f32 %v1672_v43, %v803_v40 }
 0x22a   :  { %v1209_v35 = vpop.eup %1208  ;;  %v869_v42 = vadd.f32 %v868_v39, %v804_v41  ;;  %v871_v44 = vpop.f32.mrf.mxu3 }
 0x22b   :  { %1100 = vmatmul.msk.f32.gmra.mxu0 %vm908_vm1, %v1209_v35 }
 0x22c   :  { %1210 = vtanh.f32 %v869_v42 }
 0x22f   :  { %v806_v37 = vpop.f32.mrf.mxu2 }
 0x230   :  { %v807_v45 = vadd.f32 %v1672_v43, %v806_v37 }
 0x232   :  { %v1211_v47 = vpop.eup %1210  ;;  %v872_v48 = vadd.f32 %v871_v44, %v807_v45  ;;  %v874_v49 = vpop.f32.mrf.mxu3 }
 0x233   :  { %1101 = vmatmul.msk.f32.gmra.mxu0 %vm908_vm1, %v1211_v47 }
 0x234   :  { %1212 = vtanh.f32 %v872_v48 }
 0x237   :  { %v809_v50 = vpop.f32.mrf.mxu2 }
 0x238   :  { %v810_v51 = vadd.f32 %v1672_v43, %v809_v50 }
 0x23a   :  { %v1213_v52 = vpop.eup %1212  ;;  %v875_v53 = vadd.f32 %v874_v49, %v810_v51  ;;  %v877_v56 = vpop.f32.mrf.mxu3 }
 0x23b   :  { %1102 = vmatmul.msk.f32.gmra.mxu0 %vm908_vm1, %v1213_v52 }
 0x23c   :  { %1214 = vtanh.f32 %v875_v53 }
 0x23f   :  { %v812_v54 = vpop.f32.mrf.mxu2 }
 0x240   :  { %v813_v55 = vadd.f32 %v1672_v43, %v812_v54 }
 0x242   :  { %v1215_v57 = vpop.eup %1214  ;;  %v878_v58 = vadd.f32 %v877_v56, %v813_v55 }
 0x243   :  { %1103 = vmatmul.msk.f32.gmra.mxu0 %vm908_vm1, %v1215_v57 }
 0x244   :  { %1216 = vtanh.f32 %v878_v58 }
 0x24a   :  { %v1217_v59 = vpop.eup %1216 }
 0x24b   :  { %1104 = vmatmul.msk.f32.gmra.mxu0 %vm908_vm1, %v1217_v59 }
 0x250   :  { %v974_v61 = vpop.f32.mrf.mxu0 }
 0x251   :  { %v975_v62 = vadd.f32 %v1121_v60, %v974_v61 }
 0x253   :  { %1022 = vst [vmem:[#allocation5] sm:$0xff] %v975_v62 }
 0x258   :  { %v977_v63 = vpop.f32.mrf.mxu0 }
 0x259   :  { %v978_v0 = vadd.f32 %v1121_v60, %v977_v63 }
 0x25b   :  { %1023 = vst [vmem:[#allocation5 + $0x8] sm:$0xff] %v978_v0 }
 0x260   :  { %v980_v43 = vpop.f32.mrf.mxu0 }
 0x261   :  { %v981_v1 = vadd.f32 %v1121_v60, %v980_v43 }
 0x263   :  { %1024 = vst [vmem:[#allocation5 + $0x10] sm:$0xff] %v981_v1 }
 0x268   :  { %v983_v2 = vpop.f32.mrf.mxu0 }
 0x269   :  { %v984_v3 = vadd.f32 %v1121_v60, %v983_v2 }
 0x26b   :  { %1025 = vst [vmem:[#allocation5 + $0x18] sm:$0xff] %v984_v3 }
 0x270   :  { %v986_v4 = vpop.f32.mrf.mxu0 }
 0x271   :  { %v987_v5 = vadd.f32 %v1121_v60, %v986_v4 }
 0x273   :  { %1026 = vst [vmem:[#allocation5 + $0x20] sm:$0xff] %v987_v5 }
 0x278   :  { %v989_v6 = vpop.f32.mrf.mxu0 }
 0x279   :  { %v990_v7 = vadd.f32 %v1121_v60, %v989_v6 }
 0x27b   :  { %1027 = vst [vmem:[#allocation5 + $0x28] sm:$0xff] %v990_v7 }
 0x280   :  { %v992_v8 = vpop.f32.mrf.mxu0 }
 0x281   :  { %v993_v10 = vadd.f32 %v1121_v60, %v992_v8 }
 0x283   :  { %1028 = vst [vmem:[#allocation5 + $0x30] sm:$0xff] %v993_v10 }
 0x288   :  { %v995_v9 = vpop.f32.mrf.mxu0 }
 0x289   :  { %v996_v11 = vadd.f32 %v1121_v60, %v995_v9 }
 0x28b   :  { %1029 = vst [vmem:[#allocation5 + $0x38] sm:$0xff] %v996_v11 }
 0x290   :  { %v998_v12 = vpop.f32.mrf.mxu0 }
 0x291   :  { %v999_v13 = vadd.f32 %v1121_v60, %v998_v12 }
 0x293   :  { %1030 = vst [vmem:[#allocation5 + $0x40] sm:$0xff] %v999_v13 }
 0x298   :  { %v1001_v14 = vpop.f32.mrf.mxu0 }
 0x299   :  { %v1002_v15 = vadd.f32 %v1121_v60, %v1001_v14 }
 0x29b   :  { %1031 = vst [vmem:[#allocation5 + $0x48] sm:$0xff] %v1002_v15 }
 0x2a0   :  { %v1004_v16 = vpop.f32.mrf.mxu0 }
 0x2a1   :  { %v1005_v17 = vadd.f32 %v1121_v60, %v1004_v16 }
 0x2a3   :  { %1032 = vst [vmem:[#allocation5 + $0x50] sm:$0xff] %v1005_v17 }
 0x2a8   :  { %v1007_v18 = vpop.f32.mrf.mxu0 }
 0x2a9   :  { %v1008_v19 = vadd.f32 %v1121_v60, %v1007_v18 }
 0x2ab   :  { %1033 = vst [vmem:[#allocation5 + $0x58] sm:$0xff] %v1008_v19 }
 0x2b0   :  { %v1010_v20 = vpop.f32.mrf.mxu0 }
 0x2b1   :  { %v1011_v21 = vadd.f32 %v1121_v60, %v1010_v20 }
 0x2b3   :  { %1034 = vst [vmem:[#allocation5 + $0x60] sm:$0xff] %v1011_v21 }
 0x2b8   :  { %v1013_v22 = vpop.f32.mrf.mxu0 }
 0x2b9   :  { %v1014_v23 = vadd.f32 %v1121_v60, %v1013_v22 }
 0x2bb   :  { %1035 = vst [vmem:[#allocation5 + $0x68] sm:$0xff] %v1014_v23 }
 0x2c0   :  { %v1016_v24 = vpop.f32.mrf.mxu0 }
 0x2c1   :  { %v1017_v25 = vadd.f32 %v1121_v60, %v1016_v24 }
 0x2c3   :  { %1036 = vst [vmem:[#allocation5 + $0x70] sm:$0xff] %v1017_v25 }
 0x2c8   :  { %v1019_v26 = vpop.f32.mrf.mxu0 }
 0x2c9   :  { %v1020_v27 = vadd.f32 %v1121_v60, %v1019_v26 }
 0x2cb   :  { %1037 = vst [vmem:[#allocation5 + $0x78] sm:$0xff] %v1020_v27 }
 0x2cc   :  { %1050 = dma.vmem_to_hbm [thread:$0]  %s1043_s20, 2048, %s1045_s23, [#allocation4], %s1274_s24, %s1274_s24, %s1275_s25  }
 0x2cd   :  { %1268 = dma.done.wait [#allocation4], 2048  }
 0x2ce   :  { %1269 = vsyncadd [#allocation4], 4294965248 }
 0x2cf   :  { %1055 = vsyncpa [#allocation3], 1 }
 0x2d0   :  { %1056 = vsyncpa [#allocation4], 1 }

</bundles_post_ra>
